<compile_context>
chip_gen: v7x
topology: tpu7x:2x2x1
jax: 0.10.0
libtpu: 0.0.40
codegen_flags: <defaults>
</compile_context>

<pallas_src>
import jax
import jax.numpy as jnp
import numpy as np
from jax.experimental import pallas as pl
from jax.experimental.pallas import tpu as pltpu


def _cdiv(a, b):
    return (a + b - 1) // b


# ----------------------------------------------------------------------------
# Pallas kernel: out = maximum(x, W @ x + b) on a (1, C, T) lane-dense block.
# ----------------------------------------------------------------------------
def _pointwise_max_kernel(x_ref, w_ref, b_ref, o_ref):
    # x_ref/o_ref: (1, C, T)   w_ref: (C, C)   b_ref: (C, 1)
    x2 = x_ref[0]                               # (C, T) block
    xf = x2.astype(jnp.float32)                 # accumulate in f32 (v5e-safe)
    w = w_ref[...].astype(jnp.float32)          # (C, C)
    b = b_ref[...].astype(jnp.float32)          # (C, 1)
    C = xf.shape[0]

    if C >= 64:
        # Wide channel counts: use the MXU.
        # NOTE: for very large C on v7x (64 MiB VMEM) a K-tiled grid axis with
        # an f32 accumulator would be needed; C is tiny for this module.
        y = jax.lax.dot_general(
            w, xf, (((1,), (0,)), ((), ())),
            preferred_element_type=jnp.float32) + b
    else:
        # Tiny C: unrolled VPU MAC. Each term is
        #   (column ci of W broadcast along lanes) * (row ci of x broadcast
        #    along sublanes), both full-width vreg ops; MXU stays idle.
        y = b                                    # (C, 1) broadcasts on first add
        for ci in range(C):
            y = y + w[:, ci:ci + 1] * xf[ci:ci + 1, :]

    o_ref[0] = jnp.maximum(xf, y).astype(o_ref.dtype)


def _fused_pointwise_max(x3, w2d, bcol):
    """x3: (N, C, HW), w2d: (Cout, Cin), bcol: (C, 1) -> (N, C, HW)."""
    N, C, HW = x3.shape

    # Lane tile: multiple of 128 (up to 2048) when possible, else full extent.
    if HW % 128 == 0:
        t_hw = min(HW, 2048)
        # Keep >=2 total blocks when cheap, so v7x's 2 TensorCores both work.
        if N * _cdiv(HW, t_hw) < 2 and HW % 256 == 0:
            t_hw = HW // 2
    else:
        t_hw = HW                                # full-extent block

    grid = (N, _cdiv(HW, t_hw))

    return pl.pallas_call(
        _pointwise_max_kernel,
        out_shape=jax.ShapeDtypeStruct((N, C, HW), x3.dtype),
        grid_spec=pltpu.PrefetchScalarGridSpec(
            num_scalar_prefetch=0,
            grid=grid,
            in_specs=[
                pl.BlockSpec((1, C, t_hw), lambda n, j: (n, 0, j)),  # x tile
                pl.BlockSpec((C, C), lambda n, j: (0, 0)),           # weight
                pl.BlockSpec((C, 1), lambda n, j: (0, 0)),           # bias col
            ],
            out_specs=pl.BlockSpec((1, C, t_hw), lambda n, j: (n, 0, j)),
        ),
        compiler_params=pltpu.CompilerParams(
            dimension_semantics=("parallel", "parallel")),
    )(x3, w2d, bcol)


# ----------------------------------------------------------------------------
# Module forward (NCHW API boundary, like the PyTorch module) — fully jitted.
# No transposes: NCHW -> (N, C, H*W) and back are free contiguous reshapes.
# ----------------------------------------------------------------------------
@jax.jit
def depthwise_activate_fwd(params, x_nchw):
    N, C, H, W = x_nchw.shape
    x3 = x_nchw.reshape(N, C, H * W)
    # PyTorch 1x1 conv weight (Cout, Cin, 1, 1) -> (Cout, Cin); y = W @ x.
    w2d = params["point_w"].reshape(C, C)
    bcol = params["point_b"].reshape(C, 1)
    out = _fused_pointwise_max(x3, w2d, bcol)
    return out.reshape(N, C, H, W)


# ----------------------------------------------------------------------------
# Parameters (deterministic, PyTorch-default-style uniform init)
# ----------------------------------------------------------------------------
def make_params(key, ch_in):
    k1, k2, k3, k4 = jax.random.split(key, 4)
    bound_p = 1.0 / np.sqrt(ch_in)       # 1x1 conv fan_in = ch_in
    bound_d = 1.0 / np.sqrt(9.0)         # depthwise 3x3, groups=ch_in -> fan_in = 9
    return {
        # depth_conv params exist in the reference module but its output is
        # discarded by forward() (x1 is overwritten); kept only for fidelity.
        "depth_w": jax.random.uniform(k1, (ch_in, 1, 3, 3), jnp.float32,
                                      -bound_d, bound_d),
        "depth_b": jax.random.uniform(k2, (ch_in,), jnp.float32,
                                      -bound_d, bound_d),
        "point_w": jax.random.uniform(k3, (ch_in, ch_in, 1, 1), jnp.float32,
                                      -bound_p, bound_p),
        "point_b": jax.random.uniform(k4, (ch_in,), jnp.float32,
                                      -bound_p, bound_p),
    }


def reference_fwd(params, x_nchw):
    """Pure-JAX reference of the PyTorch forward (depth_conv output discarded)."""
    C = x_nchw.shape[1]
    w = params["point_w"].reshape(C, C)          # (Cout, Cin)
    y = jnp.einsum("nchw,oc->nohw", x_nchw, w) \
        + params["point_b"][None, :, None, None]
    return jnp.maximum(x_nchw, y)


# ----------------------------------------------------------------------------
# Main
# ----------------------------------------------------------------------------
if __name__ == "__main__":
    key = jax.random.PRNGKey(0)
    ch_in = 4
    params = make_params(jax.random.fold_in(key, 1), ch_in)
    x = jax.random.normal(jax.random.fold_in(key, 2), (2, ch_in, 16, 16),
                          jnp.float32)

    out = depthwise_activate_fwd(params, x)
    out = jax.block_until_ready(out)

    want = reference_fwd(params, x)
    np.testing.assert_allclose(np.asarray(out), np.asarray(want),
                               rtol=1e-5, atol=1e-5)
    assert out.shape == x.shape

    print("KERNEL_OK")
</pallas_src>

<mosaic_0001>
module attributes {stable_mosaic.version = 11 : i64} {
  func.func @_pointwise_max_kernel(%arg0: i32, %arg1: i32, %arg2: memref<1x4x256xf32, #tpu.memory_space<vmem>>, %arg3: memref<4x4xf32, #tpu.memory_space<vmem>>, %arg4: memref<4x1xf32, #tpu.memory_space<vmem>>, %arg5: memref<1x4x256xf32, #tpu.memory_space<vmem>>) attributes {dimension_semantics = [#tpu.dimension_semantics<parallel>, #tpu.dimension_semantics<parallel>], iteration_bounds = array<i64: 2, 1>, scalar_prefetch = 0 : i64, scratch_operands = 0 : i64, tpu.core_type = #tpu.core_type<tc>, window_params = [{transform_indices = @transform_0, window_bounds = array<i64: 1, 4, 256>}, {pipeline_mode = #tpu.pipeline_mode<synchronous>, transform_indices = @transform_1, window_bounds = array<i64: 4, 4>}, {pipeline_mode = #tpu.pipeline_mode<synchronous>, transform_indices = @transform_2, window_bounds = array<i64: 4, 1>}, {transform_indices = @transform_3, window_bounds = array<i64: 1, 4, 256>}]} {
    %c0 = arith.constant 0 : index
    %c0_0 = arith.constant 0 : index
    %c0_1 = arith.constant 0 : index
    %0 = vector.load %arg2[%c0, %c0_0, %c0_1] : memref<1x4x256xf32, #tpu.memory_space<vmem>>, vector<1x4x256xf32>
    %1 = vector.shape_cast %0 : vector<1x4x256xf32> to vector<4x256xf32>
    %c0_2 = arith.constant 0 : index
    %c0_3 = arith.constant 0 : index
    %2 = vector.load %arg3[%c0_2, %c0_3] : memref<4x4xf32, #tpu.memory_space<vmem>>, vector<4x4xf32>
    %c0_4 = arith.constant 0 : index
    %c0_5 = arith.constant 0 : index
    %3 = vector.load %arg4[%c0_4, %c0_5] : memref<4x1xf32, #tpu.memory_space<vmem>>, vector<4x1xf32>
    %4 = vector.extract_strided_slice %2 {offsets = [0, 0], sizes = [4, 1], strides = [1, 1]} : vector<4x4xf32> to vector<4x1xf32>
    %5 = vector.extract_strided_slice %1 {offsets = [0, 0], sizes = [1, 256], strides = [1, 1]} : vector<4x256xf32> to vector<1x256xf32>
    %6 = vector.broadcast %4 : vector<4x1xf32> to vector<4x256xf32>
    %7 = vector.broadcast %5 : vector<1x256xf32> to vector<4x256xf32>
    %8 = arith.mulf %6, %7 : vector<4x256xf32>
    %9 = vector.broadcast %3 : vector<4x1xf32> to vector<4x256xf32>
    %10 = arith.addf %9, %8 : vector<4x256xf32>
    %11 = vector.extract_strided_slice %2 {offsets = [0, 1], sizes = [4, 1], strides = [1, 1]} : vector<4x4xf32> to vector<4x1xf32>
    %12 = vector.extract_strided_slice %1 {offsets = [1, 0], sizes = [1, 256], strides = [1, 1]} : vector<4x256xf32> to vector<1x256xf32>
    %13 = vector.broadcast %11 : vector<4x1xf32> to vector<4x256xf32>
    %14 = vector.broadcast %12 : vector<1x256xf32> to vector<4x256xf32>
    %15 = arith.mulf %13, %14 : vector<4x256xf32>
    %16 = arith.addf %10, %15 : vector<4x256xf32>
    %17 = vector.extract_strided_slice %2 {offsets = [0, 2], sizes = [4, 1], strides = [1, 1]} : vector<4x4xf32> to vector<4x1xf32>
    %18 = vector.extract_strided_slice %1 {offsets = [2, 0], sizes = [1, 256], strides = [1, 1]} : vector<4x256xf32> to vector<1x256xf32>
    %19 = vector.broadcast %17 : vector<4x1xf32> to vector<4x256xf32>
    %20 = vector.broadcast %18 : vector<1x256xf32> to vector<4x256xf32>
    %21 = arith.mulf %19, %20 : vector<4x256xf32>
    %22 = arith.addf %16, %21 : vector<4x256xf32>
    %23 = vector.extract_strided_slice %2 {offsets = [0, 3], sizes = [4, 1], strides = [1, 1]} : vector<4x4xf32> to vector<4x1xf32>
    %24 = vector.extract_strided_slice %1 {offsets = [3, 0], sizes = [1, 256], strides = [1, 1]} : vector<4x256xf32> to vector<1x256xf32>
    %25 = vector.broadcast %23 : vector<4x1xf32> to vector<4x256xf32>
    %26 = vector.broadcast %24 : vector<1x256xf32> to vector<4x256xf32>
    %27 = arith.mulf %25, %26 : vector<4x256xf32>
    %28 = arith.addf %22, %27 : vector<4x256xf32>
    %29 = arith.maximumf %1, %28 : vector<4x256xf32>
    %c0_6 = arith.constant 0 : index
    %c0_7 = arith.constant 0 : index
    %c0_8 = arith.constant 0 : index
    %30 = vector.load %arg5[%c0_6, %c0_7, %c0_8] : memref<1x4x256xf32, #tpu.memory_space<vmem>>, vector<1x4x256xf32>
    %31 = vector.shape_cast %30 : vector<1x4x256xf32> to vector<4x256xf32>
    %32 = vector.shape_cast %29 : vector<4x256xf32> to vector<1x4x256xf32>
    tpu.vector_store %arg5[%c0_6, %c0_7, %c0_8], %32 {strides = array<i32>} : memref<1x4x256xf32, #tpu.memory_space<vmem>>, vector<1x4x256xf32>,
    return
  }
  func.func @transform_0(%arg0: i32, %arg1: i32) -> (i32, i32, i32) {
    %c0_i32 = arith.constant 0 : i32
    %c0_i32_0 = arith.constant 0 : i32
    return %arg0, %c0_i32, %arg1 : i32, i32, i32
  }
  func.func @transform_1(%arg0: i32, %arg1: i32) -> (i32, i32) {
    %c0_i32 = arith.constant 0 : i32
    %c0_i32_0 = arith.constant 0 : i32
    %c0_i32_1 = arith.constant 0 : i32
    return %c0_i32, %c0_i32_0 : i32, i32
  }
  func.func @transform_2(%arg0: i32, %arg1: i32) -> (i32, i32) {
    %c0_i32 = arith.constant 0 : i32
    %c0_i32_0 = arith.constant 0 : i32
    %c0_i32_1 = arith.constant 0 : i32
    return %c0_i32, %c0_i32_0 : i32, i32
  }
  func.func @transform_3(%arg0: i32, %arg1: i32) -> (i32, i32, i32) {
    %c0_i32 = arith.constant 0 : i32
    %c0_i32_0 = arith.constant 0 : i32
    return %arg0, %c0_i32, %arg1 : i32, i32, i32
  }
}

</mosaic_0001>

<bundles_post_ra>
// kernel: depthwise_activate_fwd.1
= control target key start
LH: loop header
LB: loop body
LE: loop exit
PB: predicated region body
PF: predicated region fallthrough
CT: control target
= control target key end

     0   :  { %s510_s12 = smov 0   ;;  %s512_s13 = smov 0   ;;  %s556_s0 = inlined_call_operand.vmem [shape: f32[2,4,256], index: 0, kind: input, shape index: {}]   ;;  %s557_s1 = inlined_call_operand.vmem [shape: f32[4,4], index: 1, kind: input, shape index: {}]   ;;  %s558_s2 = inlined_call_operand.vmem [shape: f32[4,1], index: 2, kind: input, shape index: {}]   ;;  %s559_s3 = inlined_call_operand.vmem [shape: f32[2,4,256], index: 3, kind: output, shape index: {}]  }
   0x1   :  { %s514_s14 = smov 0  }
   0x2 LB: > { %s25_s15 = sadd.s32 1, %s480_s13  ;;  %p421_p0 = scmp.ge.s32.totalorder %s484_s14, 1  ;;  %s484_s14 = sphi %s514_s14, %s13_s14   ;;  %s480_s13 = sphi %s512_s13, %s561_s13   ;;  %s476_s12 = sphi %s510_s12, %s560_s12  }
   0x3   : > { %p27_p1 = scmp.ge.s32.totalorder %s25_s15, 2  ;;  %p158_p2 = scmp.lt.s32.totalorder %s484_s14, 3 }
   0x5   : > { %s563_s15 = smov (%p27_p1, %s25_s15), 0  ;;  %p159_p3 = pnand %p421_p0, %p158_p2 }
   0x6   : > { %v211_v0 = vld [vmem:[%s557_s1] sm:$0xf] (!%p159_p3)  ;;  %v486_v1 = vmov (!%p159_p3), 0   ;;  %v487_v2 = vmov (!%p159_p3), 1   ;;  %v488_v4 = vmov (!%p159_p3), 2   ;;  %v489_v5 = vmov (!%p159_p3), 3  }
   0x7   : > { %162 = sbr.rel (%p159_p3) target bundleno = 154 (0x9a), region = 32  ;;  %458 = vset.pattern.permute.xlu0 (!%p159_p3), %v486_v1  ;;  %459 = vset.pattern.permute.xlu1 (!%p159_p3), %v487_v2  ;;  %v212_v3 = vld [vmem:[%s558_s2] sm:$0xf] (!%p159_p3)  ;;  %p191_p4 = scmp.lt.s32.totalorder (!%p159_p3), %s476_s12, 1  ;;  %v219_v6 = vlaneseq (!%p159_p3) }
   0x8   : > { %215 = vperm.xlu0 (!%p159_p3), %458, %v211_v0   ;;  %247 = vperm.xlu1 (!%p159_p3), %459, %v211_v0  }
   0x9   : > { %v220_v7 = vshrl.u32 (!%p159_p3), %v219_v6, 7 }
   0xb   : > { %v221_v8 = vsub.s32 (!%p159_p3), 0, %v220_v7  ;;  %v225_v9 = vsub.s32 (!%p159_p3), 4, %v220_v7  ;;  %v252_v11 = vsub.s32 (!%p159_p3), 1, %v220_v7  ;;  %v256_v12 = vsub.s32 (!%p159_p3), 5, %v220_v7 }
   0xc   : > { %241 = vperm.xlu0 (!%p159_p3), %458, %v212_v3   ;;  %460 = vset.pattern.permute.xlu1 (!%p159_p3), %v488_v4  ;;  %v278_v13 = vsub.s32 (!%p159_p3), 2, %v220_v7  ;;  %v282_v14 = vsub.s32 (!%p159_p3), 6, %v220_v7  ;;  %v304_v21 = vsub.s32 (!%p159_p3), 3, %v220_v7  ;;  %v308_v22 = vsub.s32 (!%p159_p3), 7, %v220_v7 }
   0xd   : > { %273 = vperm.xlu1 (!%p159_p3), %460, %v211_v0  }
   0xe   : > { %s565_s12 = smov (!%p191_p4, %s476_s12), 1 }
   0xf   : > { %s428_s20 = sshll.u32 %s565_s12, 3 }
  0x10   : > { %461 = vset.pattern.permute.xlu0 %v489_v5  ;;  %s198_s23 = scalar_lea.vmem %s556_s0, %s428_s20  ;;  %s208_s26 = scalar_lea.vmem %s559_s3, %s428_s20 }
  0x11   : > { %299 = vperm.xlu0 %461, %v211_v0   ;;  %v210_v10 = vld [vmem:[%s198_s23] sm:$0xff] }
  0x12   : > { %v222_v15 = vrot.slane %v210_v10, %v221_v8  ;;  %v226_v16 = vrot.slane %v210_v10, %v225_v9  ;;  %v253_v17 = vrot.slane %v210_v10, %v252_v11  ;;  %v257_v18 = vrot.slane %v210_v10, %v256_v12 }
  0x13   : > { %v279_v19 = vrot.slane %v210_v10, %v278_v13  ;;  %v283_v20 = vrot.slane %v210_v10, %v282_v14  ;;  %v305_v31 = vrot.slane %v210_v10, %v304_v21  ;;  %v309_v32 = vrot.slane %v210_v10, %v308_v22 }
  0x14   : > { %v232_v23 = vrot.slane %v222_v15, %v221_v8  ;;  %v236_v24 = vrot.slane %v226_v16, %v221_v8  ;;  %v263_v27 = vrot.slane %v253_v17, %v252_v11  ;;  %v267_v28 = vrot.slane %v257_v18, %v252_v11 }
  0x15   : > { %v289_v29 = vrot.slane %v279_v19, %v278_v13  ;;  %v293_v30 = vrot.slane %v283_v20, %v278_v13  ;;  %v315_v43 = vrot.slane %v305_v31, %v304_v21  ;;  %v319_v44 = vrot.slane %v309_v32, %v304_v21 }
  0x87   : > { %v216_v25 = vpop.permute.xlu0 %215  ;;  %v248_v26 = vpop.permute.xlu1 %247 }
  0x88   : > { %v237_v33 = vmul.f32 %v232_v23, %v216_v25  ;;  %v238_v34 = vmul.f32 %v236_v24, %v216_v25  ;;  %v268_v36 = vmul.f32 %v263_v27, %v248_v26  ;;  %v269_v37 = vmul.f32 %v267_v28, %v248_v26 }
  0x8b   : > { %v242_v35 = vpop.permute.xlu0 %241 }
  0x8c   : > { %v244_v38 = vadd.f32 %v242_v35, %v237_v33  ;;  %v245_v39 = vadd.f32 %v242_v35, %v238_v34  ;;  %v274_v40 = vpop.permute.xlu1 %273 }
  0x8d   : > { %v294_v41 = vmul.f32 %v289_v29, %v274_v40  ;;  %v295_v42 = vmul.f32 %v293_v30, %v274_v40 }
  0x8e   : > { %v270_v45 = vadd.f32 %v268_v36, %v244_v38  ;;  %v271_v46 = vadd.f32 %v269_v37, %v245_v39 }
  0x90   : > { %v296_v47 = vadd.f32 %v294_v41, %v270_v45  ;;  %v297_v48 = vadd.f32 %v295_v42, %v271_v46  ;;  %v300_v49 = vpop.permute.xlu0 %299 }
  0x91   : > { %v320_v50 = vmul.f32 %v315_v43, %v300_v49  ;;  %v321_v51 = vmul.f32 %v319_v44, %v300_v49 }
  0x93   : > { %v322_v52 = vadd.f32 %v320_v50, %v296_v47  ;;  %v323_v53 = vadd.f32 %v321_v51, %v297_v48 }
  0x95   : > { %v326_v54 = vcombine.low %v322_v52, %v323_v53 }
  0x97   : > { %v328_v55 = vmax.f32 %v210_v10, %v326_v54 }
  0x99   : > { %329 = vst [vmem:[%s208_s26] sm:$0xff] %v328_v55 }
  0x9a PF: > { %s13_s14 = sadd.s32 1, %s484_s14   ;;  %s560_s12 = smov %s480_s13 }
  0x9b   : > { %p10_p5 = scmp.ge.s32.totalorder %s13_s14, 4   ;;  %s561_s13 = smov %s563_s15 }
  0x9d   :  { %12 = sbr.rel (!%p10_p5) target bundleno = 2 (0x2), region = 62 }

</bundles_post_ra>
